<compile_context>
chip_gen: v7x
topology: tpu7x:2x2x1
jax: 0.10.0
libtpu: 0.0.40
codegen_flags: <defaults>
</compile_context>

<pallas_src>
import jax
import jax.numpy as jnp
from jax.experimental import pallas as pl
from jax.experimental.pallas import tpu as pltpu


def _round_up(x, m):
    return (x + m - 1) // m * m


def _feature_dropout_kernel(x_ref, m_ref, o_ref):
    # x_ref: (t_tile, C_pad) block of the input for batch b.
    # m_ref: (1, C_pad) pre-scaled mask for batch b (0 or 1/(1-p)), float32.
    x = x_ref[...].astype(jnp.float32)
    o_ref[...] = (x * m_ref[...]).astype(o_ref.dtype)   # single cast on store


def feature_dropout(x, p, seed=0, *, training=True, t_tile=512):
    """FeatureDropout forward. x: (B, T, C) or (B, C). Returns same shape/dtype."""
    if not training or p <= 0.0:
        return x
    if p >= 1.0:
        return jnp.zeros_like(x)

    orig_shape = x.shape
    if x.ndim == 3:
        B, T, C = x.shape
        x3 = x
    elif x.ndim == 2:
        B, C = x.shape
        T = 1
        x3 = x[:, None, :]
    else:
        raise ValueError("FeatureDropout expects a 2-D or 3-D input")

    itemsize = jnp.dtype(x.dtype).itemsize

    # Lane-dense channel axis.
    C_pad = _round_up(C, 128)

    # Largest length tile (multiple of 8) whose double-buffered in+out blocks
    # stay within ~48 MiB of VMEM (safe for v7x's 64 MiB physical VMEM).
    budget = 48 << 20
    max_t = max(8, (budget // (4 * C_pad * itemsize)) // 8 * 8)
    t_tile = int(min(max(8, _round_up(int(t_tile), 8)), max_t, _round_up(T, 8)))
    T_pad = _round_up(T, t_tile)

    if T_pad != T or C_pad != C:
        x3 = jnp.pad(x3, ((0, 0), (0, T_pad - T), (0, C_pad - C)))

    # Per-(b, c) keep mask, pre-scaled by 1/(1-p).  Drawn once in the wrapper
    # (tiny: B x C) so every length-tile of batch b reuses the SAME channel
    # mask, as Dropout1d requires.
    key = jax.random.PRNGKey(seed)
    keep = jax.random.bernoulli(key, 1.0 - float(p), (B, 1, C))
    mask = keep.astype(jnp.float32) * jnp.float32(1.0 / (1.0 - float(p)))
    if C_pad != C:
        mask = jnp.pad(mask, ((0, 0), (0, 0), (0, C_pad - C)))

    tile_bytes = t_tile * C_pad * itemsize
    vmem_limit = int(min(max(4 * tile_bytes + (4 << 20), 32 << 20), 64 << 20))

    out = pl.pallas_call(
        _feature_dropout_kernel,
        out_shape=jax.ShapeDtypeStruct((B, T_pad, C_pad), x.dtype),
        grid=(B, T_pad // t_tile),
        in_specs=[
            pl.BlockSpec((None, t_tile, C_pad), lambda b, t: (b, t, 0)),
            pl.BlockSpec((None, 1, C_pad), lambda b, t: (b, 0, 0)),
        ],
        out_specs=pl.BlockSpec((None, t_tile, C_pad), lambda b, t: (b, t, 0)),
        compiler_params=pltpu.CompilerParams(
            dimension_semantics=("parallel", "parallel"),
            vmem_limit_bytes=vmem_limit,
        ),
    )(x3, mask)

    out = out[:, :T, :C]
    return out.reshape(orig_shape)


if __name__ == "__main__":
    key = jax.random.PRNGKey(0)
    k_x3, k_x2 = jax.random.split(key)

    batch, seq, hidden = 2, 8, 32
    p = 0.5

    # ---- 3-D path: (B, T, C) — whole feature channels dropped per batch ----
    x = jax.random.normal(k_x3, (batch, seq, hidden), dtype=jnp.float32)
    out = jax.block_until_ready(feature_dropout(x, p, seed=1234, training=True))
    assert out.shape == x.shape and out.dtype == x.dtype

    # Dropout1d property: each (b, c) column is either all zeros or x/(1-p).
    scaled = x / (1.0 - p)
    keep_col = jnp.any(out != 0.0, axis=1, keepdims=True)      # (B, 1, C)
    expected = jnp.where(keep_col, scaled, 0.0)
    assert jnp.allclose(out, expected, atol=1e-5, rtol=1e-5)

    # ---- 2-D path: (B, C) — element-wise mask with 1/(1-p) scaling ----
    x2 = jax.random.normal(k_x2, (batch, hidden), dtype=jnp.float32)
    out2 = jax.block_until_ready(feature_dropout(x2, p, seed=7, training=True))
    ok = jnp.isclose(out2, 0.0, atol=1e-6) | jnp.isclose(
        out2, x2 / (1.0 - p), atol=1e-5, rtol=1e-5)
    assert bool(jnp.all(ok))

    # ---- eval mode: identity ----
    out_eval = feature_dropout(x, p, seed=1234, training=False)
    assert jnp.array_equal(out_eval, x)

    print("KERNEL_OK")
</pallas_src>

<mosaic_0001>
module attributes {stable_mosaic.version = 11 : i64} {
  func.func @_feature_dropout_kernel(%arg0: i32, %arg1: i32, %arg2: memref<1x8x128xf32, #tpu.memory_space<vmem>>, %arg3: memref<1x1x128xf32, #tpu.memory_space<vmem>>, %arg4: memref<1x8x128xf32, #tpu.memory_space<vmem>>) attributes {dimension_semantics = [#tpu.dimension_semantics<parallel>, #tpu.dimension_semantics<parallel>], iteration_bounds = array<i64: 2, 1>, scalar_prefetch = 0 : i64, scratch_operands = 0 : i64, tpu.core_type = #tpu.core_type<tc>, window_params = [{transform_indices = @transform_0, window_bounds = array<i64: 1, 8, 128>}, {transform_indices = @transform_1, window_bounds = array<i64: 1, 1, 128>}, {transform_indices = @transform_2, window_bounds = array<i64: 1, 8, 128>}]} {
    %c0 = arith.constant 0 : index
    %c0_0 = arith.constant 0 : index
    %c0_1 = arith.constant 0 : index
    %0 = vector.load %arg2[%c0, %c0_0, %c0_1] : memref<1x8x128xf32, #tpu.memory_space<vmem>>, vector<1x8x128xf32>
    %1 = vector.shape_cast %0 : vector<1x8x128xf32> to vector<8x128xf32>
    %c0_2 = arith.constant 0 : index
    %c0_3 = arith.constant 0 : index
    %c0_4 = arith.constant 0 : index
    %2 = vector.load %arg3[%c0_2, %c0_3, %c0_4] : memref<1x1x128xf32, #tpu.memory_space<vmem>>, vector<1x1x128xf32>
    %3 = vector.shape_cast %2 : vector<1x1x128xf32> to vector<1x128xf32>
    %4 = vector.broadcast %3 : vector<1x128xf32> to vector<8x128xf32>
    %5 = arith.mulf %1, %4 : vector<8x128xf32>
    %c0_5 = arith.constant 0 : index
    %c0_6 = arith.constant 0 : index
    %c0_7 = arith.constant 0 : index
    %6 = vector.load %arg4[%c0_5, %c0_6, %c0_7] : memref<1x8x128xf32, #tpu.memory_space<vmem>>, vector<1x8x128xf32>
    %7 = vector.shape_cast %6 : vector<1x8x128xf32> to vector<8x128xf32>
    %8 = vector.shape_cast %5 : vector<8x128xf32> to vector<1x8x128xf32>
    tpu.vector_store %arg4[%c0_5, %c0_6, %c0_7], %8 {strides = array<i32>} : memref<1x8x128xf32, #tpu.memory_space<vmem>>, vector<1x8x128xf32>,
    return
  }
  func.func @transform_0(%arg0: i32, %arg1: i32) -> (i32, i32, i32) {
    %c0_i32 = arith.constant 0 : i32
    %c0_i32_0 = arith.constant 0 : i32
    return %arg0, %arg1, %c0_i32 : i32, i32, i32
  }
  func.func @transform_1(%arg0: i32, %arg1: i32) -> (i32, i32, i32) {
    %c0_i32 = arith.constant 0 : i32
    %c0_i32_0 = arith.constant 0 : i32
    %c0_i32_1 = arith.constant 0 : i32
    return %arg0, %c0_i32, %c0_i32_0 : i32, i32, i32
  }
  func.func @transform_2(%arg0: i32, %arg1: i32) -> (i32, i32, i32) {
    %c0_i32 = arith.constant 0 : i32
    %c0_i32_0 = arith.constant 0 : i32
    return %arg0, %arg1, %c0_i32 : i32, i32, i32
  }
}

</mosaic_0001>

<bundles_post_ra>
// kernel: tpu_custom_call.1
= control target key start
LH: loop header
LB: loop body
LE: loop exit
PB: predicated region body
PF: predicated region fallthrough
CT: control target
= control target key end

     0   :  { %7 = vsyncpa [#allocation3], 0  ;;  %s688_s0 = inlined_call_operand.hbm [shape: f32[2,8,128], index: 0, kind: input, shape index: {}]   ;;  %s689_s1 = inlined_call_operand.vmem [shape: f32[2,1,128], index: 1, kind: input, shape index: {}]   ;;  %s690_s2 = inlined_call_operand.hbm [shape: f32[2,8,128], index: 2, kind: output, shape index: {}]  }
   0x1   :  { %9 = vsyncpa [#allocation3 + $0x1], 0 }
   0x2   :  { %10 = vsyncpa [#allocation4], 0 }
   0x3   :  { %12 = vsyncpa [#allocation4 + $0x1], 0  ;;  %s511_s9 = smov 0   ;;  %s513_s10 = smov 0  }
   0x4   :  { %s515_s11 = smov 0   ;;  %s517_s12 = smov 0  }
   0x5   :  { %s519_s13 = smov 0   ;;  %s521_s14 = smov 0  }
   0x6 LB: > { %s304_s15 = sadd.s32 4294967295, %s492_s14   ;;  %s305_s16 = sadd.s32 4294967294, %s492_s14   ;;  %s492_s14 = sphi %s521_s14, %s18_s14   ;;  %s488_s13 = sphi %s519_s13, %s706_s13   ;;  %s484_s12 = sphi %s517_s12, %s705_s12   ;;  %s480_s11 = sphi %s515_s11, %s704_s11   ;;  %s476_s10 = sphi %s513_s10, %s703_s10   ;;  %s472_s9 = sphi %s511_s9, %s702_s9  }
   0x7   : > { %s30_s17 = sadd.s32 1, %s488_s13  ;;  %s39_s18 = sadd.s32 1, %s480_s11 }
   0x8   : > { %p32_p0 = scmp.ge.s32.totalorder %s30_s17, 2  ;;  %p46_p1 = scmp.ne.s32.totalorder %s480_s11, %s476_s10 }
   0x9   : > { %p47_p2 = scmp.eq.s32.totalorder %s492_s14, 0  ;;  %p52_p3 = scmp.ne.s32.totalorder %s476_s10, %s472_s9 }
   0xa   : > { %s708_s17 = smov (%p32_p0, %s30_s17), 0  ;;  %p53_p5 = scmp.eq.s32.totalorder %s304_s15, 0 }
   0xb   : > { %p552_p4 = por %p47_p2, %p46_p1  ;;  %s34_s20 = ssub.s32 %s488_s13, %s708_s17 }
   0xc   : > { %p104_p6 = scmp.eq.s32.totalorder %s304_s15, 1  ;;  %p37_p7 = scmp.eq.s32.totalorder %s34_s20, 0 }
   0xd   : > { %p558_p8 = por %p53_p5, %p52_p3  ;;  %p110_p10 = scmp.eq.s32.totalorder %s305_s16, 1 }
   0xe   : > { %p562_p9 = por %p104_p6, %p46_p1  ;;  %p330_p13 = scmp.lt.s32.totalorder %s492_s14, 2 }
   0xf   : > { %s567_s23 = scalar_select %p37_p7, %s480_s11, %s39_s18  }
  0x10   : > { %s694_s22 = scalar_select %p562_p9, 1, 0 }
  0x11   : > { %p569_p11 = por %p110_p10, %p52_p3  ;;  %s130_s25 = sand.u32 1, %s480_s11  }
  0x12   : > { %s308_s26 = sshll.u32 %s130_s25, 3  ;;  %s309_s27 = sshll.u32 %s488_s13, 7 }
  0x13   : > { %s695_s24 = scalar_select %p569_p11, 1, 0 }
  0x14   : > { %s580_s30 = scalar_lea.hbm %s688_s0, %s309_s27  ;;  %s134_s3 = scalar_lea.vmem [#allocation2], %s308_s26 }
  0x15   : > { %s142_s4 = sshll.u32 %s134_s3, 4  ;;  %p586_p0 = pnand %p330_p13, %p552_p4  ;;  %s582_s4 = int_to_ptr.vmem [resolvable:$true] %s142_s4 }
  0x16   : > { %s131_s6 = scalar_lea.sflag [#allocation3], %s130_s25  ;;  %s380_s7 = scalar_lea.hbm %s580_s30, 128 }
  0x17   : > { %p381_p3 = scmp.ne.s32.totalorder %s580_s30, %s380_s7  ;;  %p382_p5 = pneg %p586_p0 }
  0x18   : > { %s385_s16 = scalar_lea.hbm %s688_s0, 256  ;;  %p386_p4 = scmp.lt.u32.totalorder %s580_s30, %s688_s0 }
  0x19   : > { %p383_p6 = pnand %p382_p5, %p381_p3  ;;  %p387_p10 = scmp.lt.u32.totalorder %s385_s16, %s380_s7 }
  0x1a   : > { %p389_p12 = scmp.lt.u32.totalorder %s380_s7, %s580_s30 }
  0x1b   : > { %p384_p7 = pneg %p383_p6  ;;  %p388_p13 = por %p387_p10, %p386_p4 }
  0x1d   : > { %p390_p1 = por %p389_p12, %p388_p13 }
  0x1f   : > { %p391_p2 = pnand %p390_p1, %p384_p7 }
  0x21   : > { %394 = shalt.err (!%p391_p2)
}
  0x22   : > { %s395_s20 = scalar_lea.vmem %s582_s4, 128  ;;  %s494_s25 = smov [#allocation2]  }
  0x23   : > { %p396_p3 = scmp.ne.s32.totalorder %s582_s4, %s395_s20  ;;  %s400_s26 = sshll.u32 %s494_s25, 4  ;;  %s401_s26 = int_to_ptr.vmem [resolvable:$false] %s400_s26 }
  0x24   : > { %s402_s27 = scalar_lea.vmem %s401_s26, 256  ;;  %p403_p9 = scmp.lt.s32.totalorder %s582_s4, %s401_s26 }
  0x25   : > { %p398_p6 = pnand %p396_p3, %p382_p5  ;;  %p404_p4 = scmp.lt.s32.totalorder %s402_s27, %s395_s20 }
  0x27   : > { %p399_p11 = pneg %p398_p6  ;;  %p405_p10 = por %p404_p4, %p403_p9 }
  0x29   : > { %p406_p12 = pnand %p405_p10, %p399_p11 }
  0x2b   : > { %409 = shalt.err (!%p406_p12)
}
  0x2c   : > { %325 = dma.hbm_to_vmem [thread:$0]  (!%p586_p0), %s580_s30, 128, %s582_s4, %s131_s6  }
  0x2d   : > { %p697_p1 = scmp.lt.s32.totalorder %s492_s14, 3  ;;  %p698_p2 = scmp.ge.s32.totalorder %s492_s14, 1 }
  0x2f   : > { %p154_p5 = pnand %p698_p2, %p697_p1 }
  0x30   : > { %s622_s28 = sand.u32 (!%p154_p5), 1, %s476_s10  }
  0x31   : > { %157 = sbr.rel (%p154_p5) target bundleno = 85 (0x55), region = 28  ;;  %s311_s29 = sshll.u32 (!%p154_p5), %s622_s28, 3 }
  0x32   : > { %s160_s3 = scalar_lea.sflag (!%p154_p5), [#allocation3], %s622_s28  ;;  %s163_s7 = scalar_lea.vmem (!%p154_p5), [#allocation2], %s311_s29 }
  0x38   : > { %463 = dma.done.wait (%p558_p8), %s160_s3, 128  }
  0x39   : > { %465 = vsyncadd (%p558_p8), %s160_s3, 4294967168  ;;  %p187_p9 = scmp.lt.s32.totalorder %s484_s12, 1  ;;  %s186_s8 = scalar_lea.vmem [#allocation5], %s311_s29  ;;  %v190_v0 = vld [vmem:[%s163_s7] sm:$0xff] }
  0x3a   : > { %s215_s15 = sshll.u32 %s186_s8, 4  ;;  %s315_s16 = sshll.u32 %s484_s12, 7  ;;  %s636_s15 = int_to_ptr.vmem [resolvable:$true] %s215_s15 }
  0x3b   : > { %s188_s30 = scalar_select %p187_p9, %s484_s12, 1 }
  0x3c   : > { %s641_s19 = scalar_lea.hbm %s690_s2, %s315_s16  ;;  %s201_s20 = scalar_lea.sflag [#allocation4], %s622_s28 }
  0x3d   : > { %s189_s6 = scalar_lea.vmem %s689_s1, %s188_s30  ;;  %s410_s25 = scalar_lea.vmem %s636_s15, 128 }
  0x3e   : > { %v313_v1 = vld [vmem:[%s189_s6] ss:$0 sm:$0xff]  ;;  %p411_p8 = scmp.ne.s32.totalorder %s636_s15, %s410_s25  ;;  %p699_p11 = scmp.ne.s32.totalorder %s694_s22, 0 }
  0x3f   : > { %v198_v2 = vmul.f32 %v313_v1, %v190_v0  ;;  %s495_s12 = smov [#allocation5]  }
  0x40   : > { %p412_p0 = pnand %p411_p8, %p699_p11  ;;  %s414_s26 = sshll.u32 %s495_s12, 4  ;;  %s415_s26 = int_to_ptr.vmem [resolvable:$false] %s414_s26 }
  0x41   : > { %199 = vst [vmem:[%s186_s8] sm:$0xff] %v198_v2  ;;  %s416_s27 = scalar_lea.vmem %s415_s26, 256  ;;  %p417_p13 = scmp.lt.s32.totalorder %s636_s15, %s415_s26 }
  0x42   : > { %p413_p7 = pneg %p412_p0  ;;  %p418_p3 = scmp.lt.s32.totalorder %s416_s27, %s410_s25 }
  0x44   : > { %p419_p6 = por %p418_p3, %p417_p13 }
  0x46   : > { %p420_p4 = pnand %p419_p6, %p413_p7 }
  0x48   : > { %423 = shalt.err (!%p420_p4)
}
  0x49   : > { %s424_s28 = scalar_lea.hbm %s641_s19, 128  ;;  %s428_s7 = scalar_lea.hbm %s690_s2, 256 }
  0x4a   : > { %p425_p10 = scmp.ne.s32.totalorder %s641_s19, %s424_s28  ;;  %p429_p2 = scmp.lt.u32.totalorder %s641_s19, %s690_s2 }
  0x4b   : > { %p430_p5 = scmp.lt.u32.totalorder %s428_s7, %s424_s28  ;;  %p432_p8 = scmp.lt.u32.totalorder %s424_s28, %s641_s19 }
  0x4c   : > { %p426_p12 = pnand %p425_p10, %p699_p11 }
  0x4d   : > { %p431_p9 = por %p430_p5, %p429_p2 }
  0x4e   : > { %p427_p1 = pneg %p426_p12 }
  0x4f   : > { %p433_p0 = por %p432_p8, %p431_p9 }
  0x51   : > { %p434_p7 = pnand %p433_p0, %p427_p1 }
  0x53   : > { %437 = shalt.err (!%p434_p7)
}
  0x54   : > { %320 = dma.vmem_to_hbm [thread:$0]  (%p699_p11), %s636_s15, 128, %s641_s19, %s201_s20  }
  0x55 PF: > { %s227_s5 = sand.u32 1, %s472_s9   ;;  %p700_p13 = scmp.ne.s32.totalorder %s695_s24, 0 }
  0x56   : > { %p701_p3 = scmp.ge.s32.totalorder %s492_s14, 2  ;;  %s228_s6 = scalar_lea.sflag [#allocation4], %s227_s5 }
  0x58   : > { %p327_p6 = pnand %p701_p3, %p700_p13 }
  0x5a   : > { %467 = dma.done.wait (!%p327_p6), %s228_s6, 128  }
  0x5b   : > { %469 = vsyncadd (!%p327_p6), %s228_s6, 4294967168  ;;  %s18_s14 = sadd.s32 1, %s492_s14   ;;  %s702_s9 = smov %s476_s10 }
  0x5c   : > { %p15_p4 = scmp.ge.s32.totalorder %s18_s14, 4   ;;  %s703_s10 = smov %s480_s11 }
  0x5d   : > { %s704_s11 = smov %s567_s23  ;;  %s705_s12 = smov %s488_s13 }
  0x5e   : > { %s706_s13 = smov %s708_s17  ;;  %17 = sbr.rel (!%p15_p4) target bundleno = 6 (0x6), region = 76 }
  0x65   :  { %233 = vsyncpa [#allocation3], 1 }
  0x66   :  { %235 = vsyncpa [#allocation3 + $0x1], 1 }
  0x67   :  { %236 = vsyncpa [#allocation4], 1 }
  0x68   :  { %238 = vsyncpa [#allocation4 + $0x1], 1 }

</bundles_post_ra>
